<compile_context>
chip_gen: v6e
topology: v6e:2x2x1
jax: 0.10.0
libtpu: 0.0.40
codegen_flags: <defaults>
</compile_context>

<pallas_src>
import jax
import jax.numpy as jnp
from jax.experimental import pallas as pl
from jax.experimental.pallas import tpu as pltpu

HIDDEN = 49
FPAD = 128  # padded feature width for MXU operands (lane-dense)


def _round_up(n, m):
    return ((n + m - 1) // m) * m


def qnet_kernel(x_ref, w1_ref, b1_ref, w2_ref, b2_ref, w3_ref, b3_ref, o_ref, xs_ref):
    # Widen the (tb, input_dim) tile to a lane-dense (tb, 128) MXU operand.
    # Zero the scratch every step: cheap VMEM-only write, and it guarantees the
    # pad lanes are clean even when the grid is sharded across TensorCores
    # (so a `program_id == 0`-only init would be unsafe).
    xs_ref[...] = jnp.zeros_like(xs_ref)
    xs_ref[:, : x_ref.shape[1]] = x_ref[...]
    x = xs_ref[...]

    # Layer 1: Linear(input -> 49) + ReLU   (padded weights; zero rows/cols are exact)
    h1 = jnp.dot(x, w1_ref[...], preferred_element_type=jnp.float32) + b1_ref[...]
    h1 = jnp.maximum(h1, 0.0)
    # Layer 2: Linear(49 -> 49) + ReLU
    h2 = jnp.dot(h1, w2_ref[...], preferred_element_type=jnp.float32) + b2_ref[...]
    h2 = jnp.maximum(h2, 0.0)
    # Layer 3: Linear(49 -> output), no activation; emit only the real output lanes.
    out = jnp.dot(h2, w3_ref[...], preferred_element_type=jnp.float32) + b3_ref[...]
    o_ref[...] = out[:, : o_ref.shape[1]].astype(o_ref.dtype)


def init_params(key, input_dim, output_dim):
    """PyTorch nn.Linear default init: U(-1/sqrt(fan_in), 1/sqrt(fan_in)); weight is (out, in)."""
    def linear_init(k, fan_in, fan_out):
        kw, kb = jax.random.split(k)
        bound = 1.0 / jnp.sqrt(fan_in)
        w = jax.random.uniform(kw, (fan_out, fan_in), jnp.float32, -bound, bound)
        b = jax.random.uniform(kb, (fan_out,), jnp.float32, -bound, bound)
        return w, b

    k1, k2, k3 = jax.random.split(key, 3)
    w1, b1 = linear_init(k1, input_dim, HIDDEN)
    w2, b2 = linear_init(k2, HIDDEN, HIDDEN)
    w3, b3 = linear_init(k3, HIDDEN, output_dim)
    return {"w1": w1, "b1": b1, "w2": w2, "b2": b2, "w3": w3, "b3": b3}


def prepare_params(params, input_dim, output_dim):
    """One-time layout work: transpose to (in, out), zero-pad to (FPAD, FPAD) / (1, FPAD)."""
    def pad_wb(w, b):
        out_f, in_f = w.shape
        wp = jnp.zeros((FPAD, FPAD), jnp.float32).at[:in_f, :out_f].set(w.T)
        bp = jnp.zeros((1, FPAD), jnp.float32).at[0, :out_f].set(b)
        return wp, bp

    w1p, b1p = pad_wb(params["w1"], params["b1"])
    w2p, b2p = pad_wb(params["w2"], params["b2"])
    w3p, b3p = pad_wb(params["w3"], params["b3"])
    return {
        "w1": w1p, "b1": b1p, "w2": w2p, "b2": b2p, "w3": w3p, "b3": b3p,
        "input_dim": input_dim, "output_dim": output_dim,
    }


def qnetwork_forward(x, prep, *, block_b=1024):
    """x: (B, input_dim). prep: output of prepare_params (padded, pre-transposed). Returns (B, output_dim) f32."""
    B, input_dim = x.shape
    assert input_dim == prep["input_dim"]
    out_dim = prep["output_dim"]
    x = x.astype(jnp.float32)

    # Batch tile: multiple of 8 (sublane rule), capped by block_b, and sized so that
    # a large batch yields at least 2 grid steps (v7x has 2 TensorCores sharing the grid).
    block_b = max(8, _round_up(block_b, 8))
    half = (B + 1) // 2
    tb = min(block_b, max(8, _round_up(half, 8)))
    grid = (pl.cdiv(B, tb),)  # no batch pre-pad; ragged last tile handled by Pallas

    act_in_spec = pl.BlockSpec((tb, input_dim), lambda i: (i, 0))   # pipelined input tile (narrow last dim == full dim)
    act_out_spec = pl.BlockSpec((tb, out_dim), lambda i: (i, 0))    # compact output tile
    w_spec = pl.BlockSpec((FPAD, FPAD), lambda i: (0, 0))           # VMEM-resident weights
    b_spec = pl.BlockSpec((1, FPAD), lambda i: (0, 0))              # VMEM-resident biases

    out = pl.pallas_call(
        qnet_kernel,
        out_shape=jax.ShapeDtypeStruct((B, out_dim), jnp.float32),
        grid=grid,
        in_specs=[act_in_spec, w_spec, b_spec, w_spec, b_spec, w_spec, b_spec],
        out_specs=act_out_spec,
        scratch_shapes=[pltpu.VMEM((tb, FPAD), jnp.float32)],       # lane-padded activation staging
        compiler_params=pltpu.CompilerParams(
            dimension_semantics=("parallel",),                      # shard batch tiles across v7x's 2 TCs
            vmem_limit_bytes=32 * 1024 * 1024,                      # safe headroom even on v5e's smaller default
        ),
    )(x, prep["w1"], prep["b1"], prep["w2"], prep["b2"], prep["w3"], prep["b3"])

    return out


def reference_forward(x, params):
    h1 = jnp.maximum(x @ params["w1"].T + params["b1"], 0.0)
    h2 = jnp.maximum(h1 @ params["w2"].T + params["b2"], 0.0)
    return h2 @ params["w3"].T + params["b3"]


if __name__ == "__main__":
    key = jax.random.PRNGKey(0)
    k_params, k_x1, k_x2, k_x3 = jax.random.split(key, 4)

    # TicTacToe: 3x3 board flattened -> input_dim = 9, output_dim = 9 actions.
    input_dim, output_dim = 9, 9
    params = init_params(k_params, input_dim, output_dim)
    prep = prepare_params(params, input_dim, output_dim)

    # 1) Single exact tile (B=8 -> tb=8, grid=(1,)).
    x1 = jax.random.normal(k_x1, (8, input_dim), jnp.float32)
    y1 = jax.block_until_ready(qnetwork_forward(x1, prep))
    assert y1.shape == (8, output_dim)
    assert jnp.allclose(y1, reference_forward(x1, params), atol=1e-5, rtol=1e-5), "mismatch (B=8)"

    # 2) Multi-tile with a ragged final block (B=20, tb=16 -> grid=(2,), last tile 4 valid rows).
    x2 = jax.random.normal(k_x2, (20, input_dim), jnp.float32)
    y2 = jax.block_until_ready(qnetwork_forward(x2, prep, block_b=16))
    assert y2.shape == (20, output_dim)
    assert jnp.allclose(y2, reference_forward(x2, params), atol=1e-5, rtol=1e-5), "mismatch (B=20, ragged)"

    # 3) Default tile sizing path (B=300 -> tb=152, grid=(2,), ragged last tile).
    x3 = jax.random.normal(k_x3, (300, input_dim), jnp.float32)
    y3 = jax.block_until_ready(qnetwork_forward(x3, prep))
    assert y3.shape == (300, output_dim)
    assert jnp.allclose(y3, reference_forward(x3, params), atol=1e-5, rtol=1e-5), "mismatch (B=300, default)"

    print("KERNEL_OK")
</pallas_src>

<mosaic_0001>
module attributes {stable_mosaic.version = 11 : i64} {
  func.func @qnet_kernel(%arg0: i32, %arg1: memref<8x9xf32, #tpu.memory_space<vmem>>, %arg2: memref<128x128xf32, #tpu.memory_space<vmem>>, %arg3: memref<1x128xf32, #tpu.memory_space<vmem>>, %arg4: memref<128x128xf32, #tpu.memory_space<vmem>>, %arg5: memref<1x128xf32, #tpu.memory_space<vmem>>, %arg6: memref<128x128xf32, #tpu.memory_space<vmem>>, %arg7: memref<1x128xf32, #tpu.memory_space<vmem>>, %arg8: memref<8x9xf32, #tpu.memory_space<vmem>>, %arg9: memref<8x128xf32, #tpu.memory_space<vmem>>) attributes {dimension_semantics = [#tpu.dimension_semantics<parallel>], iteration_bounds = array<i64: 1>, scalar_prefetch = 0 : i64, scratch_operands = 1 : i64, tpu.core_type = #tpu.core_type<tc>, window_params = [{transform_indices = @transform_0, window_bounds = array<i64: 8, 9>}, {pipeline_mode = #tpu.pipeline_mode<synchronous>, transform_indices = @transform_1, window_bounds = array<i64: 128, 128>}, {pipeline_mode = #tpu.pipeline_mode<synchronous>, transform_indices = @transform_2, window_bounds = array<i64: 1, 128>}, {pipeline_mode = #tpu.pipeline_mode<synchronous>, transform_indices = @transform_3, window_bounds = array<i64: 128, 128>}, {pipeline_mode = #tpu.pipeline_mode<synchronous>, transform_indices = @transform_4, window_bounds = array<i64: 1, 128>}, {pipeline_mode = #tpu.pipeline_mode<synchronous>, transform_indices = @transform_5, window_bounds = array<i64: 128, 128>}, {pipeline_mode = #tpu.pipeline_mode<synchronous>, transform_indices = @transform_6, window_bounds = array<i64: 1, 128>}, {transform_indices = @transform_7, window_bounds = array<i64: 8, 9>}]} {
    %cst = arith.constant 0.000000e+00 : f32
    %0 = vector.broadcast %cst : f32 to vector<8x128xf32>
    %c0 = arith.constant 0 : index
    %c0_0 = arith.constant 0 : index
    %1 = vector.load %arg9[%c0, %c0_0] : memref<8x128xf32, #tpu.memory_space<vmem>>, vector<8x128xf32>
    tpu.vector_store %arg9[%c0, %c0_0], %0 {strides = array<i32>} : memref<8x128xf32, #tpu.memory_space<vmem>>, vector<8x128xf32>,
    %c0_1 = arith.constant 0 : index
    %c0_2 = arith.constant 0 : index
    %2 = vector.load %arg1[%c0_1, %c0_2] : memref<8x9xf32, #tpu.memory_space<vmem>>, vector<8x9xf32>
    %c0_3 = arith.constant 0 : index
    %c0_4 = arith.constant 0 : index
    %3 = vector.load %arg9[%c0_3, %c0_4] : memref<8x128xf32, #tpu.memory_space<vmem>>, vector<8x9xf32>
    tpu.vector_store %arg9[%c0_3, %c0_4], %2 {strides = array<i32>} : memref<8x128xf32, #tpu.memory_space<vmem>>, vector<8x9xf32>,
    %c0_5 = arith.constant 0 : index
    %c0_6 = arith.constant 0 : index
    %4 = vector.load %arg9[%c0_5, %c0_6] : memref<8x128xf32, #tpu.memory_space<vmem>>, vector<8x128xf32>
    %c0_7 = arith.constant 0 : index
    %c0_8 = arith.constant 0 : index
    %5 = vector.load %arg2[%c0_7, %c0_8] : memref<128x128xf32, #tpu.memory_space<vmem>>, vector<128x128xf32>
    %cst_9 = arith.constant dense<0.000000e+00> : vector<8x128xf32>
    %6 = tpu.matmul %4, %5, %cst_9 {dimension_numbers = #tpu.dot_dimension_numbers<[1], [0], [0], [1], [0, 0, 1, 1], [], []>} : vector<8x128xf32>, vector<128x128xf32>, vector<8x128xf32> -> vector<8x128xf32>
    %c0_10 = arith.constant 0 : index
    %c0_11 = arith.constant 0 : index
    %7 = vector.load %arg3[%c0_10, %c0_11] : memref<1x128xf32, #tpu.memory_space<vmem>>, vector<1x128xf32>
    %8 = vector.broadcast %7 : vector<1x128xf32> to vector<8x128xf32>
    %9 = arith.addf %6, %8 : vector<8x128xf32>
    %cst_12 = arith.constant 0.000000e+00 : f32
    %10 = vector.broadcast %cst_12 : f32 to vector<8x128xf32>
    %11 = arith.maximumf %9, %10 : vector<8x128xf32>
    %c0_13 = arith.constant 0 : index
    %c0_14 = arith.constant 0 : index
    %12 = vector.load %arg4[%c0_13, %c0_14] : memref<128x128xf32, #tpu.memory_space<vmem>>, vector<128x128xf32>
    %cst_15 = arith.constant dense<0.000000e+00> : vector<8x128xf32>
    %13 = tpu.matmul %11, %12, %cst_15 {dimension_numbers = #tpu.dot_dimension_numbers<[1], [0], [0], [1], [0, 0, 1, 1], [], []>} : vector<8x128xf32>, vector<128x128xf32>, vector<8x128xf32> -> vector<8x128xf32>
    %c0_16 = arith.constant 0 : index
    %c0_17 = arith.constant 0 : index
    %14 = vector.load %arg5[%c0_16, %c0_17] : memref<1x128xf32, #tpu.memory_space<vmem>>, vector<1x128xf32>
    %15 = vector.broadcast %14 : vector<1x128xf32> to vector<8x128xf32>
    %16 = arith.addf %13, %15 : vector<8x128xf32>
    %cst_18 = arith.constant 0.000000e+00 : f32
    %17 = vector.broadcast %cst_18 : f32 to vector<8x128xf32>
    %18 = arith.maximumf %16, %17 : vector<8x128xf32>
    %c0_19 = arith.constant 0 : index
    %c0_20 = arith.constant 0 : index
    %19 = vector.load %arg6[%c0_19, %c0_20] : memref<128x128xf32, #tpu.memory_space<vmem>>, vector<128x128xf32>
    %cst_21 = arith.constant dense<0.000000e+00> : vector<8x128xf32>
    %20 = tpu.matmul %18, %19, %cst_21 {dimension_numbers = #tpu.dot_dimension_numbers<[1], [0], [0], [1], [0, 0, 1, 1], [], []>} : vector<8x128xf32>, vector<128x128xf32>, vector<8x128xf32> -> vector<8x128xf32>
    %c0_22 = arith.constant 0 : index
    %c0_23 = arith.constant 0 : index
    %21 = vector.load %arg7[%c0_22, %c0_23] : memref<1x128xf32, #tpu.memory_space<vmem>>, vector<1x128xf32>
    %22 = vector.broadcast %21 : vector<1x128xf32> to vector<8x128xf32>
    %23 = arith.addf %20, %22 : vector<8x128xf32>
    %24 = vector.extract_strided_slice %23 {offsets = [0, 0], sizes = [8, 9], strides = [1, 1]} : vector<8x128xf32> to vector<8x9xf32>
    %c0_24 = arith.constant 0 : index
    %c0_25 = arith.constant 0 : index
    %25 = vector.load %arg8[%c0_24, %c0_25] : memref<8x9xf32, #tpu.memory_space<vmem>>, vector<8x9xf32>
    tpu.vector_store %arg8[%c0_24, %c0_25], %24 {strides = array<i32>} : memref<8x9xf32, #tpu.memory_space<vmem>>, vector<8x9xf32>,
    return
  }
  func.func @transform_0(%arg0: i32) -> (i32, i32) {
    %c0_i32 = arith.constant 0 : i32
    %c0_i32_0 = arith.constant 0 : i32
    return %arg0, %c0_i32 : i32, i32
  }
  func.func @transform_1(%arg0: i32) -> (i32, i32) {
    %c0_i32 = arith.constant 0 : i32
    %c0_i32_0 = arith.constant 0 : i32
    %c0_i32_1 = arith.constant 0 : i32
    return %c0_i32, %c0_i32_0 : i32, i32
  }
  func.func @transform_2(%arg0: i32) -> (i32, i32) {
    %c0_i32 = arith.constant 0 : i32
    %c0_i32_0 = arith.constant 0 : i32
    %c0_i32_1 = arith.constant 0 : i32
    return %c0_i32, %c0_i32_0 : i32, i32
  }
  func.func @transform_3(%arg0: i32) -> (i32, i32) {
    %c0_i32 = arith.constant 0 : i32
    %c0_i32_0 = arith.constant 0 : i32
    %c0_i32_1 = arith.constant 0 : i32
    return %c0_i32, %c0_i32_0 : i32, i32
  }
  func.func @transform_4(%arg0: i32) -> (i32, i32) {
    %c0_i32 = arith.constant 0 : i32
    %c0_i32_0 = arith.constant 0 : i32
    %c0_i32_1 = arith.constant 0 : i32
    return %c0_i32, %c0_i32_0 : i32, i32
  }
  func.func @transform_5(%arg0: i32) -> (i32, i32) {
    %c0_i32 = arith.constant 0 : i32
    %c0_i32_0 = arith.constant 0 : i32
    %c0_i32_1 = arith.constant 0 : i32
    return %c0_i32, %c0_i32_0 : i32, i32
  }
  func.func @transform_6(%arg0: i32) -> (i32, i32) {
    %c0_i32 = arith.constant 0 : i32
    %c0_i32_0 = arith.constant 0 : i32
    %c0_i32_1 = arith.constant 0 : i32
    return %c0_i32, %c0_i32_0 : i32, i32
  }
  func.func @transform_7(%arg0: i32) -> (i32, i32) {
    %c0_i32 = arith.constant 0 : i32
    %c0_i32_0 = arith.constant 0 : i32
    return %arg0, %c0_i32 : i32, i32
  }
}

</mosaic_0001>

<bundles_post_ra>
// kernel: tpu_custom_call.1
= control target key start
LH: loop header
LB: loop body
LE: loop exit
PB: predicated region body
PF: predicated region fallthrough
CT: control target
= control target key end

     0   :  { %12 = vsyncpa [#allocation4], 0  ;;  %s799_s0 = inlined_call_operand.hbm [shape: f32[8,9], index: 0, kind: input, shape index: {}]   ;;  %s800_s1 = inlined_call_operand.hbm [shape: f32[128,128], index: 1, kind: input, shape index: {}]   ;;  %s801_s2 = inlined_call_operand.vmem [shape: f32[1,128], index: 2, kind: input, shape index: {}]   ;;  %s802_s3 = inlined_call_operand.hbm [shape: f32[128,128], index: 3, kind: input, shape index: {}]   ;;  %s803_s4 = inlined_call_operand.vmem [shape: f32[1,128], index: 4, kind: input, shape index: {}]   ;;  %s804_s5 = inlined_call_operand.hbm [shape: f32[128,128], index: 5, kind: input, shape index: {}]   ;;  %s805_s6 = inlined_call_operand.vmem [shape: f32[1,128], index: 6, kind: input, shape index: {}]   ;;  %s806_s7 = inlined_call_operand.hbm [shape: f32[8,9], index: 7, kind: output, shape index: {}]  }
   0x1   :  { %13 = vsyncpa [#allocation7], 0 }
   0x2   :  { %14 = vsyncpa [#allocation10], 0 }
   0x3   :  { %15 = vsyncpa [#allocation5], 0  ;;  %s660_s24 = smov [#allocation6]  }
   0x4   :  { %s31_s25 = sshll.u32 %s660_s24, 4  ;;  %s32_s25 = int_to_ptr.vmem [resolvable:$true] %s31_s25 }
   0x5   :  { %s560_s26 = scalar_lea.vmem %s32_s25, 2048  ;;  %p565_p1 = scmp.lt.s32.totalorder %s32_s25, %s32_s25 }
   0x6   :  { %p561_p0 = scmp.ne.s32.totalorder %s32_s25, %s560_s26  ;;  %p566_p2 = scmp.lt.s32.totalorder %s560_s26, %s560_s26 }
   0x8   :  { %p567_p3 = por %p566_p2, %p565_p1 }
   0xa   :  { %p568_p4 = pnand %p567_p3, %p561_p0 }
   0xc   :  { %571 = shalt.err (!%p568_p4)
}
   0xd   :  { %s661_s27 = smov 128   ;;  %s662_s28 = smov 8  }
   0xe   :  { %37 = dma.hbm_to_vmem [thread:$0]  %s800_s1, 2048, %s32_s25, [#allocation7], %s661_s27, %s661_s27, %s662_s28  }
   0xf   :  { %s663_s8 = smov [#allocation3]   ;;  %s664_s10 = smov [#allocation8]  }
  0x10   :  { %s22_s9 = sshll.u32 %s663_s8, 4  ;;  %s45_s11 = sshll.u32 %s664_s10, 4  ;;  %s23_s9 = int_to_ptr.vmem [resolvable:$true] %s22_s9  ;;  %s46_s11 = int_to_ptr.vmem [resolvable:$true] %s45_s11 }
  0x11   :  { %s580_s12 = scalar_lea.vmem %s23_s9, 128  ;;  %p585_p6 = scmp.lt.s32.totalorder %s23_s9, %s23_s9 }
  0x12   :  { %p581_p5 = scmp.ne.s32.totalorder %s23_s9, %s580_s12  ;;  %p586_p7 = scmp.lt.s32.totalorder %s580_s12, %s580_s12 }
  0x14   :  { %p587_p8 = por %p586_p7, %p585_p6 }
  0x16   :  { %p588_p9 = pnand %p587_p8, %p581_p5 }
  0x18   :  { %591 = shalt.err (!%p588_p9)
}
  0x19   :  { %25 = dma.hbm_to_vmem [thread:$0]  %s799_s0, 128, %s23_s9, [#allocation4]  }
  0x1a   :  { %s600_s15 = scalar_lea.vmem %s46_s11, 2048  ;;  %p605_p11 = scmp.lt.s32.totalorder %s46_s11, %s46_s11 }
  0x1b   :  { %p601_p10 = scmp.ne.s32.totalorder %s46_s11, %s600_s15  ;;  %p606_p12 = scmp.lt.s32.totalorder %s600_s15, %s600_s15 }
  0x1d   :  { %p607_p13 = por %p606_p12, %p605_p11 }
  0x1f   :  { %p608_p0 = pnand %p607_p13, %p601_p10 }
  0x21   :  { %611 = shalt.err (!%p608_p0)
}
  0x22   :  { %51 = dma.hbm_to_vmem [thread:$0]  %s802_s3, 2048, %s46_s11, [#allocation7], %s661_s27, %s661_s27, %s662_s28  }
  0x23   :  { %s665_s17 = smov [#allocation9]  }
  0x24   :  { %s59_s18 = sshll.u32 %s665_s17, 4  ;;  %s60_s18 = int_to_ptr.vmem [resolvable:$true] %s59_s18 }
  0x25   :  { %s620_s19 = scalar_lea.vmem %s60_s18, 2048  ;;  %p625_p2 = scmp.lt.s32.totalorder %s60_s18, %s60_s18 }
  0x26   :  { %p621_p1 = scmp.ne.s32.totalorder %s60_s18, %s620_s19  ;;  %p626_p3 = scmp.lt.s32.totalorder %s620_s19, %s620_s19 }
  0x28   :  { %p627_p4 = por %p626_p3, %p625_p2 }
  0x2a   :  { %p628_p5 = pnand %p627_p4, %p621_p1 }
  0x2c   :  { %631 = shalt.err (!%p628_p5)
}
  0x2d   :  { %65 = dma.hbm_to_vmem [thread:$0]  %s804_s5, 2048, %s60_s18, [#allocation10], %s661_s27, %s661_s27, %s662_s28  }
  0x2e   :  { %652 = dma.done.wait [#allocation4], 128  }
  0x2f   :  { %653 = vsyncadd [#allocation4], 4294967168 }
  0x30   :  { %654 = dma.done.wait [#allocation7], 4096  }
  0x31   :  { %655 = vsyncadd [#allocation7], 4294963200 }
  0x32   :  { %656 = dma.done.wait [#allocation10], 2048  }
  0x33   :  { %657 = vsyncadd [#allocation10], 4294965248  ;;  %v666_v0 = vmov 0.0   ;;  %vm667_vm0 = vmmov 0   ;;  %v100_v1 = vld [vmem:[#allocation6 + $0x78] sm:$0xff]  ;;  %v99_v2 = vld [vmem:[#allocation6 + $0x70] sm:$0xff] }
  0x34   :  { %438 = vmatprep.subr.mxu0 %v666_v0  ;;  %80 = vst [vmem:[#allocation2] sm:$0xff] %v666_v0  ;;  %470 = vmatprep.mubr.msk.f32.mxu0 %vm667_vm0, %v666_v0  ;;  %v98_v3 = vld [vmem:[#allocation6 + $0x68] sm:$0xff]  ;;  %vm82_vm1 = vcmask 72704   ;;  %v97_v4 = vld [vmem:[#allocation6 + $0x60] sm:$0xff]  ;;  %v81_v5 = vld [vmem:[#allocation3] sm:$0xff]  ;;  %s668_s24 = smov [#allocation11]  }
  0x35   :  { %473 = vmatprep.subr.mxu1 %v666_v0  ;;  %505 = vmatprep.mubr.msk.f32.mxu1 %vm667_vm0, %v666_v0  ;;  %v194_v6 = vld [vmem:[#allocation8 + $0x78] sm:$0xff]  ;;  %83 = vst.msk [vmem:[#allocation2] sm:$0xff] %vm82_vm1, %v81_v5  ;;  %v193_v8 = vld [vmem:[#allocation8 + $0x70] sm:$0xff]  ;;  %v192_v9 = vld [vmem:[#allocation8 + $0x68] sm:$0xff]  ;;  %s373_s25 = sshll.u32 %s668_s24, 4  ;;  %s374_s25 = int_to_ptr.vmem [resolvable:$true] %s373_s25 }
  0x36   :  { %439 = vmatpush3.msra.mxu0 %v100_v1  ;;  %v96_v7 = vld [vmem:[#allocation6 + $0x58] sm:$0xff]  ;;  %474 = vmatpush3.msra.mxu1 %v194_v6  ;;  %v95_v10 = vld [vmem:[#allocation6 + $0x50] sm:$0xff]  ;;  %v191_v11 = vld [vmem:[#allocation8 + $0x60] sm:$0xff]  ;;  %s632_s26 = scalar_lea.vmem %s374_s25, 128  ;;  %p637_p7 = scmp.lt.s32.totalorder %s374_s25, %s374_s25 }
  0x37   :  { %440 = vmatprep.subr.mxu0 %v666_v0  ;;  %475 = vmatprep.subr.mxu1 %v666_v0  ;;  %v94_v12 = vld [vmem:[#allocation6 + $0x48] sm:$0xff]  ;;  %v190_v13 = vld [vmem:[#allocation8 + $0x58] sm:$0xff]  ;;  %v93_v14 = vld [vmem:[#allocation6 + $0x40] sm:$0xff]  ;;  %p633_p6 = scmp.ne.s32.totalorder %s374_s25, %s632_s26  ;;  %p638_p8 = scmp.lt.s32.totalorder %s632_s26, %s632_s26 }
  0x38   :  { %441 = vmatpush3.msra.mxu0 %v99_v2  ;;  %476 = vmatpush3.msra.mxu1 %v193_v8  ;;  %v189_v15 = vld [vmem:[#allocation8 + $0x50] sm:$0xff]  ;;  %v92_v16 = vld [vmem:[#allocation6 + $0x38] sm:$0xff]  ;;  %v188_v17 = vld [vmem:[#allocation8 + $0x48] sm:$0xff] }
  0x39   :  { %442 = vmatprep.subr.mxu0 %v666_v0  ;;  %477 = vmatprep.subr.mxu1 %v666_v0  ;;  %v91_v18 = vld [vmem:[#allocation6 + $0x30] sm:$0xff]  ;;  %v187_v19 = vld [vmem:[#allocation8 + $0x40] sm:$0xff]  ;;  %v90_v20 = vld [vmem:[#allocation6 + $0x28] sm:$0xff]  ;;  %p639_p9 = por %p638_p8, %p637_p7 }
  0x3a   :  { %443 = vmatpush3.msra.mxu0 %v98_v3  ;;  %478 = vmatpush3.msra.mxu1 %v192_v9  ;;  %v186_v21 = vld [vmem:[#allocation8 + $0x38] sm:$0xff]  ;;  %v89_v22 = vld [vmem:[#allocation6 + $0x20] sm:$0xff]  ;;  %v185_v23 = vld [vmem:[#allocation8 + $0x30] sm:$0xff] }
  0x3b   :  { %444 = vmatprep.subr.mxu0 %v666_v0  ;;  %479 = vmatprep.subr.mxu1 %v666_v0  ;;  %v88_v24 = vld [vmem:[#allocation6 + $0x18] sm:$0xff]  ;;  %v184_v25 = vld [vmem:[#allocation8 + $0x28] sm:$0xff]  ;;  %v87_v26 = vld [vmem:[#allocation6 + $0x10] sm:$0xff]  ;;  %p640_p10 = pnand %p639_p9, %p633_p6 }
  0x3c   :  { %445 = vmatpush3.msra.mxu0 %v97_v4  ;;  %480 = vmatpush3.msra.mxu1 %v191_v11  ;;  %v183_v27 = vld [vmem:[#allocation8 + $0x20] sm:$0xff]  ;;  %v86_v28 = vld [vmem:[#allocation6 + $0x8] sm:$0xff]  ;;  %v182_v29 = vld [vmem:[#allocation8 + $0x18] sm:$0xff] }
  0x3d   :  { %446 = vmatprep.subr.mxu0 %v666_v0  ;;  %481 = vmatprep.subr.mxu1 %v666_v0  ;;  %v85_v30 = vld [vmem:[#allocation6] sm:$0xff]  ;;  %v84_v31 = vld [vmem:[#allocation2] sm:$0xff]  ;;  %v180_v33 = vld [vmem:[#allocation8 + $0x8] sm:$0xff] }
  0x3e   :  { %447 = vmatpush3.msra.mxu0 %v96_v7  ;;  %482 = vmatpush3.msra.mxu1 %v190_v13  ;;  %v181_v32 = vld [vmem:[#allocation8 + $0x10] sm:$0xff]  ;;  %v179_v34 = vld [vmem:[#allocation8] sm:$0xff]  ;;  %v288_v35 = vld [vmem:[#allocation9 + $0x78] sm:$0xff] }
  0x3f   :  { %448 = vmatprep.subr.mxu0 %v666_v0  ;;  %483 = vmatprep.subr.mxu1 %v666_v0  ;;  %v287_v36 = vld [vmem:[#allocation9 + $0x70] sm:$0xff]  ;;  %v286_v37 = vld [vmem:[#allocation9 + $0x68] sm:$0xff]  ;;  %v285_v38 = vld [vmem:[#allocation9 + $0x60] sm:$0xff] }
  0x40   :  { %449 = vmatpush3.msra.mxu0 %v95_v10  ;;  %484 = vmatpush3.msra.mxu1 %v189_v15  ;;  %v284_v39 = vld [vmem:[#allocation9 + $0x58] sm:$0xff]  ;;  %v283_v40 = vld [vmem:[#allocation9 + $0x50] sm:$0xff]  ;;  %v282_v41 = vld [vmem:[#allocation9 + $0x48] sm:$0xff] }
  0x41   :  { %450 = vmatprep.subr.mxu0 %v666_v0  ;;  %485 = vmatprep.subr.mxu1 %v666_v0  ;;  %v281_v42 = vld [vmem:[#allocation9 + $0x40] sm:$0xff]  ;;  %v280_v43 = vld [vmem:[#allocation9 + $0x38] sm:$0xff]  ;;  %v279_v44 = vld [vmem:[#allocation9 + $0x30] sm:$0xff] }
  0x42   :  { %451 = vmatpush3.msra.mxu0 %v94_v12  ;;  %486 = vmatpush3.msra.mxu1 %v188_v17  ;;  %v278_v45 = vld [vmem:[#allocation9 + $0x28] sm:$0xff]  ;;  %v277_v46 = vld [vmem:[#allocation9 + $0x20] sm:$0xff]  ;;  %v276_v47 = vld [vmem:[#allocation9 + $0x18] sm:$0xff] }
  0x43   :  { %452 = vmatprep.subr.mxu0 %v666_v0  ;;  %487 = vmatprep.subr.mxu1 %v666_v0  ;;  %v384_v48 = vld [vmem:[%s801_s2] ss:$0 sm:$0xff]  ;;  %v274_v54 = vld [vmem:[#allocation9 + $0x8] sm:$0xff]  ;;  %v273_v55 = vld [vmem:[#allocation9] sm:$0xff] }
  0x44   :  { %453 = vmatpush3.msra.mxu0 %v93_v14  ;;  %488 = vmatpush3.msra.mxu1 %v187_v19  ;;  %v275_v53 = vld [vmem:[#allocation9 + $0x10] sm:$0xff] }
  0x45   :  { %454 = vmatprep.subr.mxu0 %v666_v0  ;;  %489 = vmatprep.subr.mxu1 %v666_v0  ;;  %v385_v56 = vld [vmem:[%s803_s4] ss:$0 sm:$0xff] }
  0x46   :  { %455 = vmatpush3.msra.mxu0 %v92_v16  ;;  %490 = vmatpush3.msra.mxu1 %v186_v21  ;;  %v386_v61 = vld [vmem:[%s805_s6] ss:$0 sm:$0xff] }
  0x47   :  { %456 = vmatprep.subr.mxu0 %v666_v0  ;;  %491 = vmatprep.subr.mxu1 %v666_v0 }
  0x48   :  { %457 = vmatpush3.msra.mxu0 %v91_v18  ;;  %492 = vmatpush3.msra.mxu1 %v185_v23 }
  0x49   :  { %458 = vmatprep.subr.mxu0 %v666_v0  ;;  %493 = vmatprep.subr.mxu1 %v666_v0 }
  0x4a   :  { %459 = vmatpush3.msra.mxu0 %v90_v20  ;;  %494 = vmatpush3.msra.mxu1 %v184_v25 }
  0x4b   :  { %460 = vmatprep.subr.mxu0 %v666_v0  ;;  %495 = vmatprep.subr.mxu1 %v666_v0 }
  0x4c   :  { %461 = vmatpush3.msra.mxu0 %v89_v22  ;;  %496 = vmatpush3.msra.mxu1 %v183_v27 }
  0x4d   :  { %462 = vmatprep.subr.mxu0 %v666_v0  ;;  %497 = vmatprep.subr.mxu1 %v666_v0 }
  0x4e   :  { %463 = vmatpush3.msra.mxu0 %v88_v24  ;;  %498 = vmatpush3.msra.mxu1 %v182_v29 }
  0x4f   :  { %464 = vmatprep.subr.mxu0 %v666_v0  ;;  %499 = vmatprep.subr.mxu1 %v666_v0 }
  0x50   :  { %465 = vmatpush3.msra.mxu0 %v87_v26  ;;  %500 = vmatpush3.msra.mxu1 %v181_v32 }
  0x51   :  { %466 = vmatprep.subr.mxu0 %v666_v0  ;;  %501 = vmatprep.subr.mxu1 %v666_v0 }
  0x52   :  { %467 = vmatpush3.msra.mxu0 %v86_v28  ;;  %502 = vmatpush3.msra.mxu1 %v180_v33 }
  0x53   :  { %468 = vmatprep.subr.mxu0 %v666_v0  ;;  %503 = vmatprep.subr.mxu1 %v666_v0 }
  0x54   :  { %469 = vmatpush3.msra.mxu0 %v85_v30  ;;  %504 = vmatpush3.msra.mxu1 %v179_v34 }
  0x55   :  { %471 = vmatmul.mubr.f32.vlgmr.msra.gmra.mxu0 %v84_v31  ;;  %508 = vmatprep.subr.mxu0 %v666_v0 }
  0x56   :  { %540 = vmatprep.mubr.msk.f32.mxu0 %vm667_vm0, %v666_v0  ;;  %509 = vmatpush3.msra.mxu0 %v288_v35 }
  0x57   :  { %510 = vmatprep.subr.mxu0 %v666_v0 }
  0x58   :  { %511 = vmatpush3.msra.mxu0 %v287_v36 }
  0x59   :  { %512 = vmatprep.subr.mxu0 %v666_v0 }
  0x5a   :  { %513 = vmatpush3.msra.mxu0 %v286_v37 }
  0x5b   :  { %514 = vmatprep.subr.mxu0 %v666_v0 }
  0x5c   :  { %515 = vmatpush3.msra.mxu0 %v285_v38 }
  0x5d   :  { %516 = vmatprep.subr.mxu0 %v666_v0 }
  0x5e   :  { %517 = vmatpush3.msra.mxu0 %v284_v39 }
  0x5f   :  { %518 = vmatprep.subr.mxu0 %v666_v0 }
  0x60   :  { %519 = vmatpush3.msra.mxu0 %v283_v40 }
  0x61   :  { %520 = vmatprep.subr.mxu0 %v666_v0 }
  0x62   :  { %521 = vmatpush3.msra.mxu0 %v282_v41 }
  0x63   :  { %522 = vmatprep.subr.mxu0 %v666_v0 }
  0x64   :  { %523 = vmatpush3.msra.mxu0 %v281_v42 }
  0x65   :  { %524 = vmatprep.subr.mxu0 %v666_v0 }
  0x66   :  { %525 = vmatpush3.msra.mxu0 %v280_v43 }
  0x67   :  { %526 = vmatprep.subr.mxu0 %v666_v0 }
  0x68   :  { %527 = vmatpush3.msra.mxu0 %v279_v44 }
  0x69   :  { %528 = vmatprep.subr.mxu0 %v666_v0 }
  0x6a   :  { %529 = vmatpush3.msra.mxu0 %v278_v45 }
  0x6b   :  { %530 = vmatprep.subr.mxu0 %v666_v0 }
  0x6c   :  { %531 = vmatpush3.msra.mxu0 %v277_v46 }
  0x6d   :  { %532 = vmatprep.subr.mxu0 %v666_v0 }
  0x6e   :  { %533 = vmatpush3.msra.mxu0 %v276_v47 }
  0x6f   :  { %534 = vmatprep.subr.mxu0 %v666_v0 }
  0x70   :  { %535 = vmatpush3.msra.mxu0 %v275_v53 }
  0x71   :  { %536 = vmatprep.subr.mxu0 %v666_v0 }
  0x72   :  { %537 = vmatpush3.msra.mxu0 %v274_v54 }
  0x73   :  { %538 = vmatprep.subr.mxu0 %v666_v0 }
  0x74   :  { %539 = vmatpush3.msra.mxu0 %v273_v55 }
 0x115   :  { %v174_v49 = vpop.f32.mrf.mxu0 }
 0x116   :  { %v175_v50 = vadd.f32 %v384_v48, %v174_v49 }
 0x117   :  { %v472_v51 = vpop.f32.mrf.mxu0 }
 0x118   :  { %v178_v52 = vmax.f32 %v175_v50, 0.0 }
 0x11a   :  { %506 = vmatmul.mubr.f32.vlgmr.msra.gmra.mxu1 %v178_v52 }
 0x1da   :  { %v268_v57 = vpop.f32.mrf.mxu1 }
 0x1db   :  { %v269_v58 = vadd.f32 %v385_v56, %v268_v57 }
 0x1dc   :  { %v507_v59 = vpop.f32.mrf.mxu1 }
 0x1dd   :  { %v272_v60 = vmax.f32 %v269_v58, 0.0 }
 0x1df   :  { %541 = vmatmul.mubr.f32.vlgmr.msra.gmra.mxu0 %v272_v60 }
 0x29f   :  { %v362_v62 = vpop.f32.mrf.mxu0 }
 0x2a0   :  { %v363_v63 = vadd.f32 %v386_v61, %v362_v62 }
 0x2a1   :  { %v542_v0 = vpop.f32.mrf.mxu0 }
 0x2a2   :  { %366 = vst.msk [vmem:[#allocation11] sm:$0xff] %vm82_vm1, %v363_v63 }
 0x2a3   :  { %643 = shalt.err (!%p640_p10)
}
 0x2a4   :  { %376 = dma.vmem_to_hbm [thread:$0]  %s374_s25, 128, %s806_s7, [#allocation5]  }
 0x2a5   :  { %658 = dma.done.wait [#allocation5], 128  }
 0x2a6   :  { %659 = vsyncadd [#allocation5], 4294967168 }
 0x2a7   :  { %380 = vsyncpa [#allocation4], 1 }
 0x2a8   :  { %381 = vsyncpa [#allocation7], 1 }
 0x2a9   :  { %382 = vsyncpa [#allocation10], 1 }
 0x2aa   :  { %383 = vsyncpa [#allocation5], 1 }

</bundles_post_ra>
